<compile_context>
chip_gen: v6e
topology: v6e:2x2x1
jax: 0.10.0
libtpu: 0.0.40
codegen_flags: <defaults>
</compile_context>

<pallas_src>
import jax
import jax.numpy as jnp
from jax.experimental import pallas as pl
from jax.experimental.pallas import tpu as pltpu

# Small shapes consistent with the module: batch 2, ngf 4, 16x16 feature maps.
N, C_IN, H, W = 2, 4, 16, 16
C_OUT = 3
KH = KW = 3

WPAD = W + 2                                 # padded row stride (18)
Q = 3 * 128                                  # lane-dense output cols per image (>= H*WPAD)
S_MAX = (KH - 1) * WPAD + (KW - 1)           # largest tap offset (38)
ROWS = pl.cdiv(S_MAX + Q, WPAD)              # padded rows so every tap slice stays in range (24)
FLAT = ROWS * WPAD                           # flattened padded length per channel (432)
K = KH * KW * C_IN                           # real im2col contraction size (36)
N_TAPS = KH * KW                             # 9
N_TAPS_PAD = 2 * ((N_TAPS + 1) // 2)         # pad tap count to even (10)
K_PAD = N_TAPS_PAD * C_IN                    # 40 -> tap-pair stores are 8-sublane aligned
N_PAIRS = N_TAPS_PAD // 2                    # 5
QT = N * Q                                   # 768 total lanes (batch folded onto lanes)


def get_image_kernel(x_ref, w_ref, o_ref, patch_ref):
    """Whole batch in one step (channels on sublanes, flat spatial+batch on lanes).

    x_ref     : (N, C_IN, FLAT)   zero-padded, spatially flattened input images
    w_ref     : (C_OUT, K_PAD)    conv weight, row order k = (dy*KW + dx)*C_IN + ci,
                                  rows [K:K_PAD) are zero
    o_ref     : (N, C_OUT, Q)     tanh(conv) on the padded-width column grid
    patch_ref : (K_PAD, N*Q)      VMEM scratch: im2col patch matrix
    """
    # im2col: every 3x3 tap (dy, dx) is a contiguous lane slice of the flattened
    # padded image (offset s = dy*WPAD + dx).  Two taps are written per store so
    # every patch write covers 8 full sublanes at an aligned sublane offset; the
    # per-image lane block (width Q=384) is lane-tile aligned.
    for n in range(N):
        lane0 = n * Q
        for p in range(N_PAIRS):
            t0, t1 = 2 * p, 2 * p + 1
            s0 = (t0 // KW) * WPAD + (t0 % KW)
            tap0 = x_ref[n, :, s0:s0 + Q]
            if t1 < N_TAPS:
                s1 = (t1 // KW) * WPAD + (t1 % KW)
                tap1 = x_ref[n, :, s1:s1 + Q]
            else:
                tap1 = jnp.zeros((C_IN, Q), jnp.float32)   # padded zero tap
            patch_ref[8 * p:8 * p + 8, lane0:lane0 + Q] = jnp.concatenate(
                [tap0, tap1], axis=0)

    # One MXU push for the whole batch: (C_OUT, K_PAD) @ (K_PAD, N*Q).
    acc = jnp.dot(w_ref[...], patch_ref[...], preferred_element_type=jnp.float32)
    out = jnp.tanh(acc)                       # EUP

    # Per-image, lane-aligned (384 = 3*128) unmasked stores.
    for n in range(N):
        o_ref[n] = out[:, n * Q:(n + 1) * Q]


@jax.jit
def get_image_g_pallas(h_code, weight):
    """h_code: (N, C_IN, H, W) f32, weight: (C_OUT, C_IN, 3, 3) f32 -> (N, C_OUT, H, W)."""
    # SAME zero padding (+ extra zero rows at the bottom so every tap slice of
    # length Q stays in bounds), then flatten spatial: a free row-major reshape.
    pad_bottom = ROWS - H - 1
    xpad = jnp.pad(h_code, ((0, 0), (0, 0), (1, pad_bottom), (1, 1)))
    x_flat = xpad.reshape(N, C_IN, FLAT)

    # Weight rows ordered tap-major / channel-minor to match the patch matrix;
    # zero-pad rows [K:K_PAD) for the padded zero tap (free on the MXU).
    w_mat = jnp.transpose(weight, (0, 2, 3, 1)).reshape(C_OUT, K)
    w_mat = jnp.pad(w_mat, ((0, 0), (0, K_PAD - K)))

    out_wide = pl.pallas_call(
        get_image_kernel,
        out_shape=jax.ShapeDtypeStruct((N, C_OUT, Q), jnp.float32),
        grid=(1,),
        in_specs=[
            pl.BlockSpec((N, C_IN, FLAT), lambda i: (0, 0, 0)),
            pl.BlockSpec((C_OUT, K_PAD), lambda i: (0, 0)),
        ],
        out_specs=pl.BlockSpec((N, C_OUT, Q), lambda i: (0, 0, 0)),
        scratch_shapes=[pltpu.VMEM((K_PAD, QT), jnp.float32)],
    )(x_flat, w_mat)

    # Drop the padded-width junk columns: free reshape + tiny slice (fused in jit).
    out = out_wide[:, :, :H * WPAD].reshape(N, C_OUT, H, WPAD)[..., :W]
    return out


def get_image_g_ref(h_code, weight):
    """Pure-JAX reference of GET_IMAGE_G.forward (conv3x3 + tanh)."""
    conv = jax.lax.conv_general_dilated(
        h_code, weight, (1, 1), "SAME",
        dimension_numbers=("NCHW", "OIHW", "NCHW"))
    return jnp.tanh(conv)


if __name__ == "__main__":
    key = jax.random.PRNGKey(0)
    kx, kw = jax.random.split(key)
    h_code = jax.random.normal(kx, (N, C_IN, H, W), jnp.float32)
    weight = jax.random.normal(kw, (C_OUT, C_IN, KH, KW), jnp.float32) * 0.1

    out = jax.block_until_ready(get_image_g_pallas(h_code, weight))
    ref = jax.block_until_ready(get_image_g_ref(h_code, weight))

    assert out.shape == (N, C_OUT, H, W)
    max_err = float(jnp.max(jnp.abs(out - ref)))
    assert jnp.allclose(out, ref, atol=1e-4, rtol=1e-4), max_err
    print("KERNEL_OK")
</pallas_src>

<mosaic_0001>
module attributes {stable_mosaic.version = 11 : i64} {
  func.func @get_image_kernel(%arg0: i32, %arg1: memref<2x4x432xf32, #tpu.memory_space<vmem>>, %arg2: memref<3x40xf32, #tpu.memory_space<vmem>>, %arg3: memref<2x3x384xf32, #tpu.memory_space<vmem>>, %arg4: memref<40x768xf32, #tpu.memory_space<vmem>>) attributes {dimension_semantics = [#tpu.dimension_semantics<arbitrary>], iteration_bounds = array<i64: 1>, scalar_prefetch = 0 : i64, scratch_operands = 1 : i64, tpu.core_type = #tpu.core_type<tc>, window_params = [{pipeline_mode = #tpu.pipeline_mode<synchronous>, transform_indices = @transform_0, window_bounds = array<i64: 2, 4, 432>}, {pipeline_mode = #tpu.pipeline_mode<synchronous>, transform_indices = @transform_1, window_bounds = array<i64: 3, 40>}, {pipeline_mode = #tpu.pipeline_mode<synchronous>, transform_indices = @transform_2, window_bounds = array<i64: 2, 3, 384>}]} {
    %c0 = arith.constant 0 : index
    %c0_0 = arith.constant 0 : index
    %c0_1 = arith.constant 0 : index
    %0 = vector.load %arg1[%c0, %c0_0, %c0_1] : memref<2x4x432xf32, #tpu.memory_space<vmem>>, vector<1x4x384xf32>
    %1 = vector.shape_cast %0 : vector<1x4x384xf32> to vector<4x384xf32>
    %c0_2 = arith.constant 0 : index
    %c0_3 = arith.constant 0 : index
    %c1 = arith.constant 1 : index
    %2 = vector.load %arg1[%c0_2, %c0_3, %c1] : memref<2x4x432xf32, #tpu.memory_space<vmem>>, vector<1x4x384xf32>
    %3 = vector.shape_cast %2 : vector<1x4x384xf32> to vector<4x384xf32>
    %4 = tpu.concatenate %1, %3 in 0 : vector<4x384xf32>, vector<4x384xf32> -> vector<8x384xf32>
    %c0_4 = arith.constant 0 : index
    %c0_5 = arith.constant 0 : index
    %5 = vector.load %arg4[%c0_4, %c0_5] : memref<40x768xf32, #tpu.memory_space<vmem>>, vector<8x384xf32>
    tpu.vector_store %arg4[%c0_4, %c0_5], %4 {strides = array<i32>} : memref<40x768xf32, #tpu.memory_space<vmem>>, vector<8x384xf32>,
    %c0_6 = arith.constant 0 : index
    %c0_7 = arith.constant 0 : index
    %c2 = arith.constant 2 : index
    %6 = vector.load %arg1[%c0_6, %c0_7, %c2] : memref<2x4x432xf32, #tpu.memory_space<vmem>>, vector<1x4x384xf32>
    %7 = vector.shape_cast %6 : vector<1x4x384xf32> to vector<4x384xf32>
    %c0_8 = arith.constant 0 : index
    %c0_9 = arith.constant 0 : index
    %c18 = arith.constant 18 : index
    %8 = vector.load %arg1[%c0_8, %c0_9, %c18] : memref<2x4x432xf32, #tpu.memory_space<vmem>>, vector<1x4x384xf32>
    %9 = vector.shape_cast %8 : vector<1x4x384xf32> to vector<4x384xf32>
    %10 = tpu.concatenate %7, %9 in 0 : vector<4x384xf32>, vector<4x384xf32> -> vector<8x384xf32>
    %c8 = arith.constant 8 : index
    %c0_10 = arith.constant 0 : index
    %11 = vector.load %arg4[%c8, %c0_10] : memref<40x768xf32, #tpu.memory_space<vmem>>, vector<8x384xf32>
    tpu.vector_store %arg4[%c8, %c0_10], %10 {strides = array<i32>} : memref<40x768xf32, #tpu.memory_space<vmem>>, vector<8x384xf32>,
    %c0_11 = arith.constant 0 : index
    %c0_12 = arith.constant 0 : index
    %c19 = arith.constant 19 : index
    %12 = vector.load %arg1[%c0_11, %c0_12, %c19] : memref<2x4x432xf32, #tpu.memory_space<vmem>>, vector<1x4x384xf32>
    %13 = vector.shape_cast %12 : vector<1x4x384xf32> to vector<4x384xf32>
    %c0_13 = arith.constant 0 : index
    %c0_14 = arith.constant 0 : index
    %c20 = arith.constant 20 : index
    %14 = vector.load %arg1[%c0_13, %c0_14, %c20] : memref<2x4x432xf32, #tpu.memory_space<vmem>>, vector<1x4x384xf32>
    %15 = vector.shape_cast %14 : vector<1x4x384xf32> to vector<4x384xf32>
    %16 = tpu.concatenate %13, %15 in 0 : vector<4x384xf32>, vector<4x384xf32> -> vector<8x384xf32>
    %c16 = arith.constant 16 : index
    %c0_15 = arith.constant 0 : index
    %17 = vector.load %arg4[%c16, %c0_15] : memref<40x768xf32, #tpu.memory_space<vmem>>, vector<8x384xf32>
    tpu.vector_store %arg4[%c16, %c0_15], %16 {strides = array<i32>} : memref<40x768xf32, #tpu.memory_space<vmem>>, vector<8x384xf32>,
    %c0_16 = arith.constant 0 : index
    %c0_17 = arith.constant 0 : index
    %c36 = arith.constant 36 : index
    %18 = vector.load %arg1[%c0_16, %c0_17, %c36] : memref<2x4x432xf32, #tpu.memory_space<vmem>>, vector<1x4x384xf32>
    %19 = vector.shape_cast %18 : vector<1x4x384xf32> to vector<4x384xf32>
    %c0_18 = arith.constant 0 : index
    %c0_19 = arith.constant 0 : index
    %c37 = arith.constant 37 : index
    %20 = vector.load %arg1[%c0_18, %c0_19, %c37] : memref<2x4x432xf32, #tpu.memory_space<vmem>>, vector<1x4x384xf32>
    %21 = vector.shape_cast %20 : vector<1x4x384xf32> to vector<4x384xf32>
    %22 = tpu.concatenate %19, %21 in 0 : vector<4x384xf32>, vector<4x384xf32> -> vector<8x384xf32>
    %c24 = arith.constant 24 : index
    %c0_20 = arith.constant 0 : index
    %23 = vector.load %arg4[%c24, %c0_20] : memref<40x768xf32, #tpu.memory_space<vmem>>, vector<8x384xf32>
    tpu.vector_store %arg4[%c24, %c0_20], %22 {strides = array<i32>} : memref<40x768xf32, #tpu.memory_space<vmem>>, vector<8x384xf32>,
    %c0_21 = arith.constant 0 : index
    %c0_22 = arith.constant 0 : index
    %c38 = arith.constant 38 : index
    %24 = vector.load %arg1[%c0_21, %c0_22, %c38] : memref<2x4x432xf32, #tpu.memory_space<vmem>>, vector<1x4x384xf32>
    %25 = vector.shape_cast %24 : vector<1x4x384xf32> to vector<4x384xf32>
    %cst = arith.constant 0.000000e+00 : f32
    %26 = vector.broadcast %cst : f32 to vector<4x384xf32>
    %27 = tpu.concatenate %25, %26 in 0 : vector<4x384xf32>, vector<4x384xf32> -> vector<8x384xf32>
    %c32 = arith.constant 32 : index
    %c0_23 = arith.constant 0 : index
    %28 = vector.load %arg4[%c32, %c0_23] : memref<40x768xf32, #tpu.memory_space<vmem>>, vector<8x384xf32>
    tpu.vector_store %arg4[%c32, %c0_23], %27 {strides = array<i32>} : memref<40x768xf32, #tpu.memory_space<vmem>>, vector<8x384xf32>,
    %c1_24 = arith.constant 1 : index
    %c0_25 = arith.constant 0 : index
    %c0_26 = arith.constant 0 : index
    %29 = vector.load %arg1[%c1_24, %c0_25, %c0_26] : memref<2x4x432xf32, #tpu.memory_space<vmem>>, vector<1x4x384xf32>
    %30 = vector.shape_cast %29 : vector<1x4x384xf32> to vector<4x384xf32>
    %c1_27 = arith.constant 1 : index
    %c0_28 = arith.constant 0 : index
    %c1_29 = arith.constant 1 : index
    %31 = vector.load %arg1[%c1_27, %c0_28, %c1_29] : memref<2x4x432xf32, #tpu.memory_space<vmem>>, vector<1x4x384xf32>
    %32 = vector.shape_cast %31 : vector<1x4x384xf32> to vector<4x384xf32>
    %33 = tpu.concatenate %30, %32 in 0 : vector<4x384xf32>, vector<4x384xf32> -> vector<8x384xf32>
    %c0_30 = arith.constant 0 : index
    %c384 = arith.constant 384 : index
    %34 = vector.load %arg4[%c0_30, %c384] : memref<40x768xf32, #tpu.memory_space<vmem>>, vector<8x384xf32>
    tpu.vector_store %arg4[%c0_30, %c384], %33 {strides = array<i32>} : memref<40x768xf32, #tpu.memory_space<vmem>>, vector<8x384xf32>,
    %c1_31 = arith.constant 1 : index
    %c0_32 = arith.constant 0 : index
    %c2_33 = arith.constant 2 : index
    %35 = vector.load %arg1[%c1_31, %c0_32, %c2_33] : memref<2x4x432xf32, #tpu.memory_space<vmem>>, vector<1x4x384xf32>
    %36 = vector.shape_cast %35 : vector<1x4x384xf32> to vector<4x384xf32>
    %c1_34 = arith.constant 1 : index
    %c0_35 = arith.constant 0 : index
    %c18_36 = arith.constant 18 : index
    %37 = vector.load %arg1[%c1_34, %c0_35, %c18_36] : memref<2x4x432xf32, #tpu.memory_space<vmem>>, vector<1x4x384xf32>
    %38 = vector.shape_cast %37 : vector<1x4x384xf32> to vector<4x384xf32>
    %39 = tpu.concatenate %36, %38 in 0 : vector<4x384xf32>, vector<4x384xf32> -> vector<8x384xf32>
    %c8_37 = arith.constant 8 : index
    %c384_38 = arith.constant 384 : index
    %40 = vector.load %arg4[%c8_37, %c384_38] : memref<40x768xf32, #tpu.memory_space<vmem>>, vector<8x384xf32>
    tpu.vector_store %arg4[%c8_37, %c384_38], %39 {strides = array<i32>} : memref<40x768xf32, #tpu.memory_space<vmem>>, vector<8x384xf32>,
    %c1_39 = arith.constant 1 : index
    %c0_40 = arith.constant 0 : index
    %c19_41 = arith.constant 19 : index
    %41 = vector.load %arg1[%c1_39, %c0_40, %c19_41] : memref<2x4x432xf32, #tpu.memory_space<vmem>>, vector<1x4x384xf32>
    %42 = vector.shape_cast %41 : vector<1x4x384xf32> to vector<4x384xf32>
    %c1_42 = arith.constant 1 : index
    %c0_43 = arith.constant 0 : index
    %c20_44 = arith.constant 20 : index
    %43 = vector.load %arg1[%c1_42, %c0_43, %c20_44] : memref<2x4x432xf32, #tpu.memory_space<vmem>>, vector<1x4x384xf32>
    %44 = vector.shape_cast %43 : vector<1x4x384xf32> to vector<4x384xf32>
    %45 = tpu.concatenate %42, %44 in 0 : vector<4x384xf32>, vector<4x384xf32> -> vector<8x384xf32>
    %c16_45 = arith.constant 16 : index
    %c384_46 = arith.constant 384 : index
    %46 = vector.load %arg4[%c16_45, %c384_46] : memref<40x768xf32, #tpu.memory_space<vmem>>, vector<8x384xf32>
    tpu.vector_store %arg4[%c16_45, %c384_46], %45 {strides = array<i32>} : memref<40x768xf32, #tpu.memory_space<vmem>>, vector<8x384xf32>,
    %c1_47 = arith.constant 1 : index
    %c0_48 = arith.constant 0 : index
    %c36_49 = arith.constant 36 : index
    %47 = vector.load %arg1[%c1_47, %c0_48, %c36_49] : memref<2x4x432xf32, #tpu.memory_space<vmem>>, vector<1x4x384xf32>
    %48 = vector.shape_cast %47 : vector<1x4x384xf32> to vector<4x384xf32>
    %c1_50 = arith.constant 1 : index
    %c0_51 = arith.constant 0 : index
    %c37_52 = arith.constant 37 : index
    %49 = vector.load %arg1[%c1_50, %c0_51, %c37_52] : memref<2x4x432xf32, #tpu.memory_space<vmem>>, vector<1x4x384xf32>
    %50 = vector.shape_cast %49 : vector<1x4x384xf32> to vector<4x384xf32>
    %51 = tpu.concatenate %48, %50 in 0 : vector<4x384xf32>, vector<4x384xf32> -> vector<8x384xf32>
    %c24_53 = arith.constant 24 : index
    %c384_54 = arith.constant 384 : index
    %52 = vector.load %arg4[%c24_53, %c384_54] : memref<40x768xf32, #tpu.memory_space<vmem>>, vector<8x384xf32>
    tpu.vector_store %arg4[%c24_53, %c384_54], %51 {strides = array<i32>} : memref<40x768xf32, #tpu.memory_space<vmem>>, vector<8x384xf32>,
    %c1_55 = arith.constant 1 : index
    %c0_56 = arith.constant 0 : index
    %c38_57 = arith.constant 38 : index
    %53 = vector.load %arg1[%c1_55, %c0_56, %c38_57] : memref<2x4x432xf32, #tpu.memory_space<vmem>>, vector<1x4x384xf32>
    %54 = vector.shape_cast %53 : vector<1x4x384xf32> to vector<4x384xf32>
    %cst_58 = arith.constant 0.000000e+00 : f32
    %55 = vector.broadcast %cst_58 : f32 to vector<4x384xf32>
    %56 = tpu.concatenate %54, %55 in 0 : vector<4x384xf32>, vector<4x384xf32> -> vector<8x384xf32>
    %c32_59 = arith.constant 32 : index
    %c384_60 = arith.constant 384 : index
    %57 = vector.load %arg4[%c32_59, %c384_60] : memref<40x768xf32, #tpu.memory_space<vmem>>, vector<8x384xf32>
    tpu.vector_store %arg4[%c32_59, %c384_60], %56 {strides = array<i32>} : memref<40x768xf32, #tpu.memory_space<vmem>>, vector<8x384xf32>,
    %c0_61 = arith.constant 0 : index
    %c0_62 = arith.constant 0 : index
    %58 = vector.load %arg2[%c0_61, %c0_62] : memref<3x40xf32, #tpu.memory_space<vmem>>, vector<3x40xf32>
    %c0_63 = arith.constant 0 : index
    %c0_64 = arith.constant 0 : index
    %59 = vector.load %arg4[%c0_63, %c0_64] : memref<40x768xf32, #tpu.memory_space<vmem>>, vector<40x768xf32>
    %cst_65 = arith.constant dense<0.000000e+00> : vector<3x768xf32>
    %60 = tpu.matmul %58, %59, %cst_65 {dimension_numbers = #tpu.dot_dimension_numbers<[1], [0], [0], [1], [0, 0, 1, 1], [], []>} : vector<3x40xf32>, vector<40x768xf32>, vector<3x768xf32> -> vector<3x768xf32>
    %61 = math.tanh %60 : vector<3x768xf32>
    %62 = vector.extract_strided_slice %61 {offsets = [0, 0], sizes = [3, 384], strides = [1, 1]} : vector<3x768xf32> to vector<3x384xf32>
    %c0_66 = arith.constant 0 : index
    %c0_67 = arith.constant 0 : index
    %c0_68 = arith.constant 0 : index
    %63 = vector.load %arg3[%c0_66, %c0_67, %c0_68] : memref<2x3x384xf32, #tpu.memory_space<vmem>>, vector<1x3x384xf32>
    %64 = vector.shape_cast %63 : vector<1x3x384xf32> to vector<3x384xf32>
    %65 = vector.shape_cast %62 : vector<3x384xf32> to vector<1x3x384xf32>
    tpu.vector_store %arg3[%c0_66, %c0_67, %c0_68], %65 {strides = array<i32>} : memref<2x3x384xf32, #tpu.memory_space<vmem>>, vector<1x3x384xf32>,
    %66 = vector.extract_strided_slice %61 {offsets = [0, 384], sizes = [3, 384], strides = [1, 1]} : vector<3x768xf32> to vector<3x384xf32>
    %c1_69 = arith.constant 1 : index
    %c0_70 = arith.constant 0 : index
    %c0_71 = arith.constant 0 : index
    %67 = vector.load %arg3[%c1_69, %c0_70, %c0_71] : memref<2x3x384xf32, #tpu.memory_space<vmem>>, vector<1x3x384xf32>
    %68 = vector.shape_cast %67 : vector<1x3x384xf32> to vector<3x384xf32>
    %69 = vector.shape_cast %66 : vector<3x384xf32> to vector<1x3x384xf32>
    tpu.vector_store %arg3[%c1_69, %c0_70, %c0_71], %69 {strides = array<i32>} : memref<2x3x384xf32, #tpu.memory_space<vmem>>, vector<1x3x384xf32>,
    return
  }
  func.func @transform_0(%arg0: i32) -> (i32, i32, i32) {
    %c0_i32 = arith.constant 0 : i32
    %c0_i32_0 = arith.constant 0 : i32
    %c0_i32_1 = arith.constant 0 : i32
    %c0_i32_2 = arith.constant 0 : i32
    return %c0_i32, %c0_i32_0, %c0_i32_1 : i32, i32, i32
  }
  func.func @transform_1(%arg0: i32) -> (i32, i32) {
    %c0_i32 = arith.constant 0 : i32
    %c0_i32_0 = arith.constant 0 : i32
    %c0_i32_1 = arith.constant 0 : i32
    return %c0_i32, %c0_i32_0 : i32, i32
  }
  func.func @transform_2(%arg0: i32) -> (i32, i32, i32) {
    %c0_i32 = arith.constant 0 : i32
    %c0_i32_0 = arith.constant 0 : i32
    %c0_i32_1 = arith.constant 0 : i32
    %c0_i32_2 = arith.constant 0 : i32
    return %c0_i32, %c0_i32_0, %c0_i32_1 : i32, i32, i32
  }
}

</mosaic_0001>

<bundles_post_ra>
// kernel: get_image_g_pallas.1
= control target key start
LH: loop header
LB: loop body
LE: loop exit
PB: predicated region body
PF: predicated region fallthrough
CT: control target
= control target key end

     0   :  { %s757_s13 = smov 127   ;;  %s758_s14 = smov 112   ;;  %vm35_vm0 = vcmask 1043456   ;;  %vm28_vm1 = vcmask 1039360   ;;  %vm220_vm2 = vcmask 736256   ;;  %vm60_vm3 = vcmask 916480   ;;  %s1120_s0 = inlined_call_operand.vmem [shape: f32[2,4,432], index: 0, kind: input, shape index: {}]   ;;  %s1121_s1 = inlined_call_operand.vmem [shape: f32[3,40], index: 1, kind: input, shape index: {}]   ;;  %s1122_s2 = inlined_call_operand.vmem [shape: f32[2,3,384], index: 2, kind: output, shape index: {}]  }
   0x1   :  { %v782_v0 = vld [vmem:[%s1120_s0 + $0x8] sm:$0xff]  ;;  %v787_v1 = vld [vmem:[%s1120_s0] sm:$0xff]  ;;  %v809_v4 = vld [vmem:[%s1120_s0 + $0x10] sm:$0xff]  ;;  %s759_s19 = smov 90   ;;  %s760_s20 = smov 92   ;;  %vm186_vm4 = vcmask 752640  }
   0x2   :  { %161 = vrot.lane.b32.xlu1 %v782_v0, %s757_s13  ;;  %157 = vrot.lane.b32.xlu0 %v787_v1, %s757_s13  ;;  %v154_v2 = vcombine.low %v782_v0, %v782_v0  ;;  %v153_v3 = vcombine.low %v787_v1, %v787_v1  ;;  %v368_v5 = vcombine.low %v809_v4, %v809_v4  ;;  %v817_v6 = vld [vmem:[%s1120_s0 + $0x18] sm:$0xff]  ;;  %v206_v10 = vsel %vm35_vm0, %v782_v0, 0.0  ;;  %s761_s21 = smov 109   ;;  %s762_s22 = smov 126  }
   0x3   :  { %v824_v7 = vcombine.low %v817_v6, %v817_v6  ;;  %v839_v8 = vcombine.high %v787_v1, %v787_v1  ;;  %v204_v11 = vsel %vm35_vm0, %v787_v1, 0.0  ;;  %v418_v12 = vsel %vm35_vm0, %v809_v4, 0.0 }
   0x4   :  { %v201_v13 = vcombine.high %v782_v0, %v782_v0  ;;  %v859_v14 = vcombine.high %v809_v4, %v809_v4  ;;  %v415_v16 = vcombine.high %v817_v6, %v817_v6  ;;  %v420_v19 = vsel %vm35_vm0, %v817_v6, 0.0 }
   0x5   :  { %v205_v9 = vsel %vm35_vm0, %v839_v8, 0.0  ;;  %vm135_vm5 = vcmask 891904   ;;  %vm84_vm6 = vcmask 1031168   ;;  %vm474_vm7 = vcmask 326656  }
   0x6   :  { %159 = vrot.lane.b32.xlu0 %v154_v2, %s757_s13  ;;  %155 = vrot.lane.b32.xlu1 %v153_v3, %s757_s13  ;;  %v207_v15 = vsel %vm35_vm0, %v201_v13, 0.0  ;;  %v419_v17 = vsel %vm35_vm0, %v859_v14, 0.0  ;;  %v421_v18 = vsel %vm35_vm0, %v415_v16, 0.0 }
   0xa   :  { %108 = vrot.lane.b32.xlu1 %v154_v2, %s757_s13  ;;  %106 = vrot.lane.b32.xlu0 %v787_v1, %s757_s13 }
   0xe   :  { %110 = vrot.lane.b32.xlu0 %v782_v0, %s757_s13  ;;  %104 = vrot.lane.b32.xlu1 %v153_v3, %s757_s13 }
  0x12   :  { %56 = vrot.lane.b32.xlu1 %v154_v2, %s758_s14  ;;  %54 = vrot.lane.b32.xlu0 %v787_v1, %s758_s14 }
  0x16   :  { %58 = vrot.lane.b32.xlu0 %v782_v0, %s758_s14  ;;  %52 = vrot.lane.b32.xlu1 %v153_v3, %s758_s14 }
  0x1a   :  { %370 = vrot.lane.b32.xlu0 %v368_v5, %s757_s13  ;;  %372 = vrot.lane.b32.xlu1 %v809_v4, %s757_s13 }
  0x1e   :  { %374 = vrot.lane.b32.xlu0 %v824_v7, %s757_s13  ;;  %320 = vrot.lane.b32.xlu1 %v368_v5, %s757_s13 }
  0x22   :  { %322 = vrot.lane.b32.xlu0 %v809_v4, %s757_s13  ;;  %324 = vrot.lane.b32.xlu1 %v824_v7, %s757_s13 }
  0x26   :  { %376 = vrot.lane.b32.xlu0 %v817_v6, %s757_s13  ;;  %270 = vrot.lane.b32.xlu1 %v368_v5, %s758_s14 }
  0x2a   :  { %272 = vrot.lane.b32.xlu0 %v809_v4, %s758_s14  ;;  %274 = vrot.lane.b32.xlu1 %v824_v7, %s758_s14 }
  0x2e   :  { %326 = vrot.lane.b32.xlu0 %v817_v6, %s757_s13  ;;  %276 = vrot.lane.b32.xlu1 %v817_v6, %s758_s14 }
  0x32   :  { %214 = vrot.lane.b32.xlu0 %v205_v9, %s759_s19  ;;  %216 = vrot.lane.b32.xlu1 %v206_v10, %s759_s19 }
  0x36   :  { %212 = vrot.lane.b32.xlu0 %v204_v11, %s759_s19  ;;  %22 = vrot.lane.b32.xlu1 %v787_v1, %s757_s13 }
  0x3a   :  { %24 = vrot.lane.b32.xlu0 %v154_v2, %s757_s13  ;;  %426 = vrot.lane.b32.xlu1 %v418_v12, %s759_s19 }
  0x3e   :  { %20 = vrot.lane.b32.xlu0 %v153_v3, %s757_s13  ;;  %218 = vrot.lane.b32.xlu1 %v207_v15, %s759_s19 }
  0x42   :  { %428 = vrot.lane.b32.xlu0 %v419_v17, %s759_s19  ;;  %432 = vrot.lane.b32.xlu1 %v421_v18, %s759_s19 }
  0x46   :  { %430 = vrot.lane.b32.xlu0 %v420_v19, %s759_s19  ;;  %240 = vrot.lane.b32.xlu1 %v368_v5, %s757_s13 }
  0x4a   :  { %242 = vrot.lane.b32.xlu0 %v809_v4, %s757_s13  ;;  %26 = vrot.lane.b32.xlu1 %v782_v0, %s757_s13 }
  0x74   :  { %v162_v20 = vpop.permute.xlu1 %161  ;;  %v158_v21 = vpop.permute.xlu0 %157 }
  0x75   :  { %v173_v22 = vsel %vm35_vm0, %v201_v13, %v162_v20 }
  0x76   :  { %184 = vrot.lane.b32.xlu0 %v173_v22, %s760_s20 }
  0x78   :  { %v160_v23 = vpop.permute.xlu0 %159  ;;  %v156_v24 = vpop.permute.xlu1 %155 }
  0x79   :  { %v165_v46 = vsel %vm28_vm1, %v160_v23, %v162_v20  ;;  %v164_v57 = vsel %vm28_vm1, %v158_v21, %v160_v23  ;;  %v163_v2 = vsel %vm28_vm1, %v156_v24, %v158_v21  ;;  %v763_v20 = vmov 0.0  }
  0x7a   :  { %v172_v50 = vsel %vm35_vm0, %v782_v0, %v165_v46  ;;  %v171_v61 = vsel %vm35_vm0, %v839_v8, %v164_v57  ;;  %v170_v9 = vsel %vm35_vm0, %v787_v1, %v163_v2  ;;  %542 = vmatprep.mubr.f32.mxu0 %v763_v20  ;;  %613 = vmatprep.mubr.f32.mxu1 %v763_v20 }
  0x7c   :  { %v109_v25 = vpop.permute.xlu1 %108  ;;  %v107_v26 = vpop.permute.xlu0 %106 }
  0x7d   :  { %v113_v51 = vsel %vm28_vm1, %v107_v26, %v109_v25 }
  0x7e   :  { %v120_v55 = vsel %vm35_vm0, %v839_v8, %v113_v51 }
  0x80   :  { %v111_v27 = vpop.permute.xlu0 %110  ;;  %v105_v28 = vpop.permute.xlu1 %104 }
  0x81   :  { %v122_v29 = vsel %vm35_vm0, %v201_v13, %v111_v27  ;;  %v112_v58 = vsel %vm28_vm1, %v105_v28, %v107_v26  ;;  %v114_v12 = vsel %vm28_vm1, %v109_v25, %v111_v27 }
  0x82   :  { %133 = vrot.lane.b32.xlu1 %v122_v29, %s761_s21  ;;  %v119_v62 = vsel %vm35_vm0, %v787_v1, %v112_v58  ;;  %v121_v17 = vsel %vm35_vm0, %v782_v0, %v114_v12 }
  0x84   :  { %v879_v30 = vpop.permute.xlu1 %56  ;;  %v881_v31 = vpop.permute.xlu0 %54 }
  0x85   :  { %v62_v21 = vsel %vm60_vm3, %v881_v31, %v879_v30 }
  0x86   :  { %v69_v24 = vsel %vm35_vm0, %v839_v8, %v62_v21 }
  0x88   :  { %v59_v32 = vpop.permute.xlu0 %58  ;;  %v883_v33 = vpop.permute.xlu1 %52 }
  0x89   :  { %v71_v45 = vsel %vm35_vm0, %v201_v13, %v59_v32  ;;  %v63_v3 = vsel %vm60_vm3, %v879_v30, %v59_v32  ;;  %v61_v28 = vsel %vm60_vm3, %v883_v33, %v881_v31 }
  0x8a   :  { %v70_v10 = vsel %vm35_vm0, %v782_v0, %v63_v3  ;;  %v68_v32 = vsel %vm35_vm0, %v787_v1, %v61_v28 }
  0x8c   :  { %v371_v34 = vpop.permute.xlu0 %370  ;;  %v885_v35 = vpop.permute.xlu1 %372 }
  0x8d   :  { %v378_v13 = vsel %vm28_vm1, %v371_v34, %v885_v35 }
  0x8e   :  { %v385_v18 = vsel %vm35_vm0, %v809_v4, %v378_v13 }
  0x90   :  { %v887_v36 = vpop.permute.xlu0 %374  ;;  %v889_v37 = vpop.permute.xlu1 %320 }
  0x91   :  { %v379_v33 = vsel %vm28_vm1, %v885_v35, %v887_v36 }
  0x94   :  { %v891_v38 = vpop.permute.xlu0 %322  ;;  %v893_v39 = vpop.permute.xlu1 %324 }
  0x95   :  { %v329_v22 = vsel %vm28_vm1, %v891_v38, %v893_v39  ;;  %v328_v46 = vsel %vm28_vm1, %v889_v37, %v891_v38 }
  0x96   :  { %v336_v25 = vsel %vm35_vm0, %v859_v14, %v329_v22 }
  0x98   :  { %v895_v40 = vpop.permute.xlu0 %376  ;;  %v897_v41 = vpop.permute.xlu1 %270 }
  0x99   :  { %v388_v42 = vsel %vm35_vm0, %v415_v16, %v895_v40 }
  0x9a   :  { %399 = vrot.lane.b32.xlu0 %v388_v42, %s760_s20  ;;  %v386_v42 = vsel %vm35_vm0, %v859_v14, %v379_v33 }
  0x9c   :  { %v902_v43 = vpop.permute.xlu0 %272  ;;  %v904_v44 = vpop.permute.xlu1 %274 }
  0x9d   :  { %v278_v29 = vsel %vm60_vm3, %v897_v41, %v902_v43  ;;  %v279_v38 = vsel %vm60_vm3, %v902_v43, %v904_v44 }
  0x9e   :  { %82 = vrot.lane.b32.xlu0 %v71_v45, %s762_s22  ;;  %v285_v34 = vsel %vm35_vm0, %v809_v4, %v278_v29 }
  0xa0   :  { %v909_v47 = vpop.permute.xlu0 %326  ;;  %v911_v48 = vpop.permute.xlu1 %276 }
  0xa1   :  { %v338_v49 = vsel %vm35_vm0, %v415_v16, %v909_v47  ;;  %v288_v52 = vsel %vm35_vm0, %v415_v16, %v911_v48  ;;  %v330_v41 = vsel %vm28_vm1, %v893_v39, %v909_v47  ;;  %v280_v35 = vsel %vm60_vm3, %v904_v44, %v911_v48 }
  0xa2   :  { %349 = vrot.lane.b32.xlu1 %v338_v49, %s761_s21  ;;  %182 = vrot.lane.b32.xlu0 %v172_v50, %s760_s20  ;;  %v337_v45 = vsel %vm35_vm0, %v817_v6, %v330_v41  ;;  %v335_v39 = vsel %vm35_vm0, %v809_v4, %v328_v46  ;;  %v287_v47 = vsel %vm35_vm0, %v817_v6, %v280_v35  ;;  %v715_v35 = vld [vmem:[%s1120_s0 + $0x18] sm:$0xf] }
  0xa3   :  { %v380_v49 = vsel %vm28_vm1, %v887_v36, %v895_v40  ;;  %v286_v48 = vsel %vm35_vm0, %v859_v14, %v279_v38 }
  0xa4   :  { %v215_v53 = vpop.permute.xlu0 %214  ;;  %v217_v54 = vpop.permute.xlu1 %216  ;;  %v387_v37 = vsel %vm35_vm0, %v817_v6, %v380_v49 }
  0xa5   :  { %v222_v56 = vsel %vm220_vm2, %v215_v53, %v217_v54 }
  0xa6   :  { %299 = vrot.lane.b32.xlu1 %v288_v52, %s762_s22  ;;  %129 = vrot.lane.b32.xlu0 %v120_v55, %s761_s21 }
  0xa7   :  { %500 = vmatprep.subr.mxu0 %v222_v56 }
  0xa8   :  { %v213_v59 = vpop.permute.xlu0 %212  ;;  %v23_v60 = vpop.permute.xlu1 %22 }
  0xa9   :  { %v221_v63 = vsel %vm220_vm2, %v213_v59, %v215_v53 }
  0xaa   :  { %180 = vrot.lane.b32.xlu1 %v171_v61, %s760_s20  ;;  %127 = vrot.lane.b32.xlu0 %v119_v62, %s761_s21 }
  0xab   :  { %501 = vmatpush1.msra.mxu0 %v221_v63 }
  0xac   :  { %v939_v5 = vpop.permute.xlu0 %24  ;;  %v427_v15 = vpop.permute.xlu1 %426 }
  0xad   :  { %v947_v11 = vsel %vm28_vm1, %v23_v60, %v939_v5 }
  0xae   :  { %178 = vrot.lane.b32.xlu1 %v170_v9, %s760_s20  ;;  %80 = vrot.lane.b32.xlu0 %v70_v10, %s762_s22 }
  0xb0   :  { %v21_v16 = vpop.permute.xlu0 %20  ;;  %v219_v23 = vpop.permute.xlu1 %218 }
  0xb1   :  { %v959_v19 = vsel %vm28_vm1, %v21_v16, %v23_v60  ;;  %v223_v27 = vsel %vm220_vm2, %v217_v54, %v219_v23 }
  0xb2   :  { %131 = vrot.lane.b32.xlu1 %v121_v17, %s761_s21  ;;  %393 = vrot.lane.b32.xlu0 %v385_v18, %s760_s20  ;;  %v37_v17 = vsel %vm35_vm0, %v839_v8, %v947_v11  ;;  %v443_v18 = vld [vmem:[%s1121_s1] sm:$0x7]  ;;  %v36_v21 = vsel %vm35_vm0, %v787_v1, %v959_v19 }
  0xb4   :  { %v429_v0 = vpop.permute.xlu0 %428  ;;  %v433_v36 = vpop.permute.xlu1 %432 }
  0xb5   :  { %v434_v26 = vsel %vm220_vm2, %v427_v15, %v429_v0 }
  0xb6   :  { %78 = vrot.lane.b32.xlu1 %v69_v24, %s762_s22  ;;  %345 = vrot.lane.b32.xlu0 %v336_v25, %s761_s21 }
  0xb7   :  { %571 = vmatprep.subr.mxu1 %v434_v26 }
  0xb8   :  { %v985_v30 = vpop.permute.xlu0 %430  ;;  %572 = vmatpush1.msra.mxu1 %v223_v27  ;;  %v1039_v50 = vpop.permute.xlu1 %240 }
  0xb9   :  { %v993_v31 = vsel %vm220_vm2, %v429_v0, %v985_v30  ;;  %v436_v0 = vsel %vm220_vm2, %v985_v30, %v433_v36 }
  0xba   :  { %76 = vrot.lane.b32.xlu1 %v68_v32, %s762_s22  ;;  %293 = vrot.lane.b32.xlu0 %v285_v34, %s762_s22 }
  0xbc   :  { %v1037_v40 = vpop.permute.xlu0 %242  ;;  %v1041_v43 = vpop.permute.xlu1 %26 }
  0xbd   :  { %v31_v34 = vsel %vm28_vm1, %v939_v5, %v1041_v43 }
  0xbe   :  { %395 = vrot.lane.b32.xlu1 %v386_v42, %s760_s20  ;;  %347 = vrot.lane.b32.xlu0 %v337_v45, %s761_s21  ;;  %v12_v45 = vld [vmem:[%s1120_s0 + $0x8] sm:$0xf] }
  0xbf   :  { %v38_v49 = vsel %vm35_vm0, %v12_v45, %v31_v34 }
  0xc2   :  { %343 = vrot.lane.b32.xlu1 %v335_v39, %s761_s21  ;;  %297 = vrot.lane.b32.xlu0 %v287_v47, %s762_s22 }
  0xc6   :  { %397 = vrot.lane.b32.xlu1 %v387_v37, %s760_s20  ;;  %244 = vrot.lane.b32.xlu0 %v824_v7, %s757_s13 }
  0xca   :  { %295 = vrot.lane.b32.xlu1 %v286_v48, %s762_s22 }
  0xce   :  { %246 = vrot.lane.b32.xlu1 %v817_v6, %s757_s13 }
  0xe8   :  { %v185_v51 = vpop.permute.xlu0 %184 }
  0xf4   :  { %v134_v52 = vpop.permute.xlu1 %133 }
 0x10c   :  { %v400_v44 = vpop.permute.xlu0 %399 }
 0x110   :  { %v1043_v53 = vpop.permute.xlu0 %82 }
 0x114   :  { %v350_v7 = vpop.permute.xlu1 %349  ;;  %v183_v54 = vpop.permute.xlu0 %182 }
 0x115   :  { %v189_v11 = vsel %vm186_vm4, %v183_v54, %v185_v51 }
 0x118   :  { %v1045_v55 = vpop.permute.xlu1 %299  ;;  %v130_v56 = vpop.permute.xlu0 %129 }
 0x11c   :  { %v181_v57 = vpop.permute.xlu1 %180  ;;  %v128_v58 = vpop.permute.xlu0 %127 }
 0x11d   :  { %v188_v6 = vsel %vm186_vm4, %v181_v57, %v183_v54  ;;  %v136_v3 = vsel %vm135_vm5, %v128_v58, %v130_v56 }
 0x11e   :  { %502 = vmatprep.subr.mxu0 %v188_v6 }
 0x120   :  { %v179_v59 = vpop.permute.xlu1 %178  ;;  %v1048_v60 = vpop.permute.xlu0 %80 }
 0x121   :  { %v187_v61 = vsel %vm186_vm4, %v179_v59, %v181_v57  ;;  %v87_v46 = vsel %vm84_vm6, %v1048_v60, %v1043_v53 }
 0x122   :  { %503 = vmatpush1.msra.mxu0 %v187_v61 }
 0x124   :  { %v132_v62 = vpop.permute.xlu1 %131  ;;  %v394_v63 = vpop.permute.xlu0 %393 }
 0x125   :  { %v137_v2 = vsel %vm135_vm5, %v130_v56, %v132_v62  ;;  %v138_v24 = vsel %vm135_vm5, %v132_v62, %v134_v52 }
 0x126   :  { %504 = vmatprep.subr.mxu0 %v137_v2 }
 0x127   :  { %505 = vmatpush1.msra.mxu0 %v136_v3 }
 0x128   :  { %v79_v9 = vpop.permute.xlu1 %78  ;;  %v346_v10 = vpop.permute.xlu0 %345 }
 0x129   :  { %v86_v12 = vsel %vm84_vm6, %v79_v9, %v1048_v60 }
 0x12a   :  { %506 = vmatprep.subr.mxu0 %v86_v12 }
 0x12c   :  { %v77_v13 = vpop.permute.xlu1 %76  ;;  %v294_v15 = vpop.permute.xlu0 %293 }
 0x12d   :  { %v85_v16 = vsel %vm84_vm6, %v77_v13, %v79_v9 }
 0x12e   :  { %507 = vmatpush1.msra.mxu0 %v85_v16 }
 0x12f   :  { %508 = vmatprep.subr.mxu0 %v37_v17 }
 0x130   :  { %v396_v22 = vpop.permute.xlu1 %395  ;;  %509 = vmatpush1.msra.mxu0 %v36_v21  ;;  %v348_v23 = vpop.permute.xlu0 %347 }
 0x131   :  { %642 = vmatprep.subr.mxu0 %v436_v0  ;;  %725 = vmatmul.mubr.msk.f32.vlgmr.msra.gmra.mxu0 %vm474_vm7, %v443_v18  ;;  %v401_v8 = vsel %vm186_vm4, %v394_v63, %v396_v22  ;;  %v353_v29 = vsel %vm135_vm5, %v348_v23, %v350_v7  ;;  %v352_v30 = vsel %vm135_vm5, %v346_v10, %v348_v23 }
 0x132   :  { %573 = vmatprep.subr.mxu1 %v401_v8  ;;  %643 = vmatpush1.msra.mxu0 %v993_v31 }
 0x133   :  { %574 = vmatpush1.msra.mxu1 %v189_v11  ;;  %684 = vmatprep.mubr.f32.mxu0 %v763_v20  ;;  %v248_v20 = vsel %vm28_vm1, %v1039_v50, %v1037_v40 }
 0x134   :  { %v344_v1 = vpop.permute.xlu1 %343  ;;  %v298_v25 = vpop.permute.xlu0 %297  ;;  %v254_v5 = vsel %vm35_vm0, %v809_v4, %v248_v20 }
 0x135   :  { %v351_v19 = vsel %vm135_vm5, %v344_v1, %v346_v10  ;;  %v303_v42 = vsel %vm84_vm6, %v298_v25, %v1045_v55 }
 0x136   :  { %575 = vmatprep.subr.mxu1 %v351_v19 }
 0x137   :  { %576 = vmatpush1.msra.mxu1 %v138_v24 }
 0x138   :  { %v398_v26 = vpop.permute.xlu1 %397  ;;  %v245_v31 = vpop.permute.xlu0 %244 }
 0x139   :  { %v402_v27 = vsel %vm186_vm4, %v396_v22, %v398_v26  ;;  %v403_v28 = vsel %vm186_vm4, %v398_v26, %v400_v44  ;;  %v249_v39 = vsel %vm28_vm1, %v1037_v40, %v245_v31 }
 0x13a   :  { %644 = vmatprep.subr.mxu0 %v403_v28  ;;  %v255_v4 = vsel %vm35_vm0, %v859_v14, %v249_v39 }
 0x13b   :  { %645 = vmatpush1.msra.mxu0 %v402_v27 }
 0x13c   :  { %v296_v32 = vpop.permute.xlu1 %295  ;;  %646 = vmatprep.subr.mxu0 %v353_v29 }
 0x13d   :  { %v302_v33 = vsel %vm84_vm6, %v296_v32, %v298_v25  ;;  %647 = vmatpush1.msra.mxu0 %v352_v30  ;;  %v301_v41 = vsel %vm84_vm6, %v294_v15, %v296_v32 }
 0x13e   :  { %577 = vmatprep.subr.mxu1 %v301_v41  ;;  %648 = vmatprep.subr.mxu0 %v303_v42 }
 0x13f   :  { %578 = vmatpush1.msra.mxu1 %v87_v46  ;;  %649 = vmatpush1.msra.mxu0 %v302_v33 }
 0x140   :  { %v247_v47 = vpop.permute.xlu1 %246  ;;  %579 = vmatprep.subr.mxu1 %v254_v5 }
 0x141   :  { %v250_v37 = vsel %vm28_vm1, %v245_v31, %v247_v47  ;;  %580 = vmatpush1.msra.mxu1 %v38_v49 }
 0x142   :  { %726 = vmatmul.mubr.msk.f32.vlgmr.msra.gmra.mxu1 %vm474_vm7, %v443_v18  ;;  %v256_v38 = vsel %vm35_vm0, %v715_v35, %v250_v37 }
 0x143   :  { %650 = vmatprep.subr.mxu0 %v256_v38 }
 0x144   :  { %651 = vmatpush1.msra.mxu0 %v255_v4 }
 0x145   :  { %727 = vmatmul.mubr.msk.f32.vlgmr.msra.gmra.mxu0 %vm474_vm7, %v443_v18 }
 0x1f1   :  { %v544_v48 = vpop.f32.mrf.mxu0 }
 0x1f2   :  { %745 = vtanh.f32 %v544_v48 }
 0x1f3   :  { %v546_v36 = vpop.f32.mrf.mxu0 }
 0x1f4   :  { %747 = vtanh.f32 %v546_v36 }
 0x1ff   :  { %v746_v40 = vpop.eup %745 }
 0x201   :  { %v748_v50 = vpop.eup %747 }
 0x202   :  { %v699_v51 = vcombine.low %v746_v40, %v748_v50  ;;  %v615_v43 = vpop.f32.mrf.mxu1 }
 0x203   :  { %749 = vtanh.f32 %v615_v43 }
 0x204   :  { %701 = vst [vmem:[%s1122_s2] sm:$0x77] %v699_v51  ;;  %v617_v44 = vpop.f32.mrf.mxu1 }
 0x205   :  { %751 = vtanh.f32 %v617_v44  ;;  %v686_v52 = vpop.f32.mrf.mxu0 }
 0x206   :  { %753 = vtanh.f32 %v686_v52 }
 0x207   :  { %v688_v14 = vpop.f32.mrf.mxu0 }
 0x208   :  { %755 = vtanh.f32 %v688_v14 }
 0x210   :  { %v750_v53 = vpop.eup %749 }
 0x211   :  { %702 = vst [vmem:[%s1122_s2 + $0x8] sm:$0x7] %v750_v53 }
 0x212   :  { %v752_v7 = vpop.eup %751 }
 0x213   :  { %v754_v54 = vpop.eup %753 }
 0x214   :  { %v705_v55 = vcombine.low %v752_v7, %v754_v54 }
 0x215   :  { %v756_v56 = vpop.eup %755 }
 0x216   :  { %728 = vst [vmem:[%s1122_s2 + $0xc] sm:$0x77] %v705_v55  ;;  %729 = vst [vmem:[%s1122_s2 + $0x14] sm:$0x7] %v756_v56 }

</bundles_post_ra>
